<compile_context>
chip_gen: v5e
topology: v5e:2x2
jax: 0.10.0
libtpu: 0.0.40
codegen_flags: <defaults>
</compile_context>

<pallas_src>
import functools
import math

import jax
import jax.numpy as jnp
from jax.experimental import pallas as pl
from jax.experimental.pallas import tpu as pltpu


# Matmul-operand dtype. f32 accumulation everywhere; elementwise math is f32.
MXU_DTYPE = jnp.bfloat16


def _row_tile(m, max_tile=512, min_grid=2):
    """Largest multiple-of-8 divisor of m (<= max_tile) that still leaves at
    least `min_grid` grid steps (so v7x's 2 TensorCores both get work)."""
    if m % 8 != 0:
        return m
    divisors = [d for d in range(8, min(m, max_tile) + 1, 8) if m % d == 0]
    for d in reversed(divisors):
        if m // d >= min_grid:
            return d
    return divisors[-1] if divisors else m


# ----------------------------------------------------------------------------
# Kernel: plain linear (input embedding)
# ----------------------------------------------------------------------------

def _linear_kernel(x_ref, w_ref, b_ref, o_ref):
    x = x_ref[...]
    w = w_ref[...]
    acc = jnp.dot(x.astype(w.dtype), w, preferred_element_type=jnp.float32)
    acc = acc + b_ref[...].astype(jnp.float32)          # (1, N) broadcasts
    o_ref[...] = acc.astype(o_ref.dtype)


def linear(x, w, b):
    """x: (M, K) @ w: (K, N) + b: (N,), row-tiled over M."""
    M, K = x.shape
    N = w.shape[1]
    tm = _row_tile(M)
    return pl.pallas_call(
        _linear_kernel,
        out_shape=jax.ShapeDtypeStruct((M, N), x.dtype),
        grid=(M // tm,),
        in_specs=[
            pl.BlockSpec((tm, K), lambda i: (i, 0)),
            pl.BlockSpec((K, N), lambda i: (0, 0)),
            pl.BlockSpec((1, N), lambda i: (0, 0)),
        ],
        out_specs=pl.BlockSpec((tm, N), lambda i: (i, 0)),
        compiler_params=pltpu.CompilerParams(dimension_semantics=("parallel",)),
    )(x, w, b.reshape(1, N))


# ----------------------------------------------------------------------------
# Kernel: fused attention sub-layer
#   out = LayerNorm(x_q + W_o @ MHA(x_q, x_kv))   — one pallas_call per sublayer
# ----------------------------------------------------------------------------

def _attn_ln_kernel(xq_ref, xkv_ref, wqkv_ref, bqkv_ref, wo_ref, bo_ref,
                    g_ref, bln_ref, o_ref, *, num_heads, causal, is_self, eps):
    D = wo_ref.shape[0]
    dh = D // num_heads
    scale = 1.0 / math.sqrt(dh)

    xq = xq_ref[0].astype(jnp.float32)              # (Tq, D), also the residual
    wqkv = wqkv_ref[...]
    bqkv = bqkv_ref[...].astype(jnp.float32)        # (1, 3D)

    if is_self:
        # Fused QKV projection: one (Tq, D) x (D, 3D) MXU pass.
        qkv = jnp.dot(xq.astype(wqkv.dtype), wqkv,
                      preferred_element_type=jnp.float32) + bqkv
        q = qkv[:, :D]
        k = qkv[:, D:2 * D]
        v = qkv[:, 2 * D:]
    else:
        xkv = xkv_ref[0].astype(jnp.float32)
        q = jnp.dot(xq.astype(wqkv.dtype), wqkv[:, :D],
                    preferred_element_type=jnp.float32) + bqkv[:, :D]
        kv = jnp.dot(xkv.astype(wqkv.dtype), wqkv[:, D:],
                     preferred_element_type=jnp.float32) + bqkv[:, D:]
        k = kv[:, :D]
        v = kv[:, D:]

    Tq = q.shape[0]
    Tk = k.shape[0]

    if causal:
        row = jax.lax.broadcasted_iota(jnp.int32, (Tq, Tk), 0)
        col = jax.lax.broadcasted_iota(jnp.int32, (Tq, Tk), 1)
        neg = jnp.where(col <= row, jnp.float32(0.0), jnp.float32(-1e30))

    # Per-head attention on static lane slices (no transposes; VMEM-resident).
    heads = []
    for h in range(num_heads):
        qh = q[:, h * dh:(h + 1) * dh]
        kh = k[:, h * dh:(h + 1) * dh]
        vh = v[:, h * dh:(h + 1) * dh]
        # q @ k^T expressed via dot_general dimension numbers (no transpose op)
        s = jax.lax.dot_general(qh, kh, (((1,), (1,)), ((), ())),
                                preferred_element_type=jnp.float32) * scale
        if causal:
            s = s + neg
        m = jnp.max(s, axis=-1, keepdims=True)
        p = jnp.exp(s - m)
        denom = jnp.sum(p, axis=-1, keepdims=True)
        p = p * pl.reciprocal(denom, approx=True)        # EUP vrcp, ~free
        heads.append(jnp.dot(p, vh, preferred_element_type=jnp.float32))
    attn = jnp.concatenate(heads, axis=-1)               # (Tq, D)

    wo = wo_ref[...]
    proj = jnp.dot(attn.astype(wo.dtype), wo,
                   preferred_element_type=jnp.float32)
    proj = proj + bo_ref[...].astype(jnp.float32)

    # Residual + LayerNorm epilogue (f32)
    y = xq + proj
    mu = jnp.mean(y, axis=-1, keepdims=True)
    var = jnp.mean((y - mu) * (y - mu), axis=-1, keepdims=True)
    yn = (y - mu) * jax.lax.rsqrt(var + eps)
    o_ref[0] = (yn * g_ref[...].astype(jnp.float32)
                + bln_ref[...].astype(jnp.float32)).astype(o_ref.dtype)


def attn_ln_block(x_q, x_kv, p_attn, p_ln, num_heads, *, causal=False,
                  is_self=False, eps=1e-5):
    """x_q: (B, Tq, D), x_kv: (B, Tk, D) -> LN(x_q + MHA(x_q, x_kv)) : (B, Tq, D)."""
    B, Tq, D = x_q.shape
    Tk = x_kv.shape[1]
    return pl.pallas_call(
        functools.partial(_attn_ln_kernel, num_heads=num_heads, causal=causal,
                          is_self=is_self, eps=eps),
        out_shape=jax.ShapeDtypeStruct((B, Tq, D), x_q.dtype),
        grid=(B,),
        in_specs=[
            pl.BlockSpec((1, Tq, D), lambda b: (b, 0, 0)),
            pl.BlockSpec((1, Tk, D), lambda b: (b, 0, 0)),
            pl.BlockSpec((D, 3 * D), lambda b: (0, 0)),
            pl.BlockSpec((1, 3 * D), lambda b: (0, 0)),
            pl.BlockSpec((D, D), lambda b: (0, 0)),
            pl.BlockSpec((1, D), lambda b: (0, 0)),
            pl.BlockSpec((1, D), lambda b: (0, 0)),
            pl.BlockSpec((1, D), lambda b: (0, 0)),
        ],
        out_specs=pl.BlockSpec((1, Tq, D), lambda b: (b, 0, 0)),
        compiler_params=pltpu.CompilerParams(dimension_semantics=("parallel",)),
    )(x_q, x_kv,
      p_attn["w_qkv"], p_attn["b_qkv"].reshape(1, 3 * D),
      p_attn["wo"], p_attn["bo"].reshape(1, D),
      p_ln["g"].reshape(1, D), p_ln["b"].reshape(1, D))


# ----------------------------------------------------------------------------
# Kernel: fused FFN sub-layer
#   out = LayerNorm(x + W2 @ relu(W1 @ x))  — hidden stays in VMEM
# ----------------------------------------------------------------------------

def _ffn_ln_kernel(x_ref, w1_ref, b1_ref, w2_ref, b2_ref, g_ref, bln_ref,
                   o_ref, *, eps):
    x = x_ref[...].astype(jnp.float32)                    # (tm, D)
    w1 = w1_ref[...]
    h = jnp.dot(x.astype(w1.dtype), w1, preferred_element_type=jnp.float32)
    h = jnp.maximum(h + b1_ref[...].astype(jnp.float32), 0.0)   # (tm, F) in VMEM
    w2 = w2_ref[...]
    y = jnp.dot(h.astype(w2.dtype), w2, preferred_element_type=jnp.float32)
    y = y + b2_ref[...].astype(jnp.float32)
    y = y + x                                             # residual
    mu = jnp.mean(y, axis=-1, keepdims=True)
    var = jnp.mean((y - mu) * (y - mu), axis=-1, keepdims=True)
    yn = (y - mu) * jax.lax.rsqrt(var + eps)
    o_ref[...] = (yn * g_ref[...].astype(jnp.float32)
                  + bln_ref[...].astype(jnp.float32)).astype(o_ref.dtype)


def ffn_ln_block(x, p_ffn, p_ln, eps=1e-5):
    """x: (B, T, D) -> LN(x + FFN(x)), one fused kernel, row-tiled."""
    B, T, D = x.shape
    F = p_ffn["w1"].shape[1]
    M = B * T
    tm = _row_tile(M)
    xf = x.reshape(M, D)
    out = pl.pallas_call(
        functools.partial(_ffn_ln_kernel, eps=eps),
        out_shape=jax.ShapeDtypeStruct((M, D), x.dtype),
        grid=(M // tm,),
        in_specs=[
            pl.BlockSpec((tm, D), lambda i: (i, 0)),
            pl.BlockSpec((D, F), lambda i: (0, 0)),
            pl.BlockSpec((1, F), lambda i: (0, 0)),
            pl.BlockSpec((F, D), lambda i: (0, 0)),
            pl.BlockSpec((1, D), lambda i: (0, 0)),
            pl.BlockSpec((1, D), lambda i: (0, 0)),
            pl.BlockSpec((1, D), lambda i: (0, 0)),
        ],
        out_specs=pl.BlockSpec((tm, D), lambda i: (i, 0)),
        compiler_params=pltpu.CompilerParams(dimension_semantics=("parallel",)),
    )(xf, p_ffn["w1"], p_ffn["b1"].reshape(1, F), p_ffn["w2"],
      p_ffn["b2"].reshape(1, D), p_ln["g"].reshape(1, D),
      p_ln["b"].reshape(1, D))
    return out.reshape(B, T, D)


# ----------------------------------------------------------------------------
# Model glue
# ----------------------------------------------------------------------------

def encoder_forward(params, x):
    """x: (B, T_in, C) -> encout: (B, T_in, D)."""
    B, T, C = x.shape
    D = params["embed_w"].shape[1]
    H = params["num_heads"]
    h = linear(x.reshape(-1, C), params["embed_w"], params["embed_b"]).reshape(B, T, D)
    for layer in params["layers"]:
        h = attn_ln_block(h, h, layer["self_attn"], layer["ln1"], H,
                          causal=False, is_self=True)
        h = ffn_ln_block(h, layer["ffn"], layer["ln2"])
    return h


def decoder_forward(params, pred, encout):
    """pred: (B, T_out, C), encout: (B, T_in, D) -> hidden_states: (B, T_out, D)."""
    B, T, C = pred.shape
    D = params["embed_w"].shape[1]
    H = params["num_heads"]
    h = linear(pred.reshape(-1, C), params["embed_w"], params["embed_b"]).reshape(B, T, D)
    for layer in params["layers"]:
        h = attn_ln_block(h, h, layer["self_attn"], layer["ln1"], H,
                          causal=True, is_self=True)
        h = attn_ln_block(h, encout, layer["cross_attn"], layer["ln2"], H,
                          causal=False, is_self=False)
        h = ffn_ln_block(h, layer["ffn"], layer["ln3"])
    return h


def tdnast_forward(params, input_sequences, pred_sequences):
    """input_sequences: (B, T_in, C); pred_sequences: (B, C, T_out)
    -> hidden_states: (B, T_out, D)."""
    encout = encoder_forward(params["encoder"], input_sequences)
    pred = jnp.transpose(pred_sequences, (0, 2, 1))       # == torch .transpose(1, 2)
    return decoder_forward(params["decoder"], pred, encout)


# ----------------------------------------------------------------------------
# Deterministic parameter construction
# ----------------------------------------------------------------------------

class _ParamGen:
    def __init__(self, key):
        self.key = key

    def normal(self, shape, scale=0.02, dtype=jnp.float32):
        self.key, sub = jax.random.split(self.key)
        return (scale * jax.random.normal(sub, shape)).astype(dtype)

    def zeros(self, shape):
        return jnp.zeros(shape, jnp.float32)

    def ones(self, shape):
        return jnp.ones(shape, jnp.float32)


def _make_attn_params(g, D):
    # Fused Q|K|V projection weight (D, 3D); matmul weights stored in bf16.
    return {
        "w_qkv": g.normal((D, 3 * D), dtype=MXU_DTYPE),
        "b_qkv": g.zeros((3 * D,)),
        "wo": g.normal((D, D), dtype=MXU_DTYPE),
        "bo": g.zeros((D,)),
    }


def _make_ffn_params(g, D, F):
    return {"w1": g.normal((D, F), dtype=MXU_DTYPE), "b1": g.zeros((F,)),
            "w2": g.normal((F, D), dtype=MXU_DTYPE), "b2": g.zeros((D,))}


def _make_ln_params(g, D):
    return {"g": g.ones((D,)), "b": g.zeros((D,))}


def make_params(key, channels, d_model, num_heads, d_ff,
                num_encoder_layers, num_decoder_layers):
    g = _ParamGen(key)
    enc_layers = []
    for _ in range(num_encoder_layers):
        enc_layers.append({
            "self_attn": _make_attn_params(g, d_model),
            "ln1": _make_ln_params(g, d_model),
            "ffn": _make_ffn_params(g, d_model, d_ff),
            "ln2": _make_ln_params(g, d_model),
        })
    dec_layers = []
    for _ in range(num_decoder_layers):
        dec_layers.append({
            "self_attn": _make_attn_params(g, d_model),
            "ln1": _make_ln_params(g, d_model),
            "cross_attn": _make_attn_params(g, d_model),
            "ln2": _make_ln_params(g, d_model),
            "ffn": _make_ffn_params(g, d_model, d_ff),
            "ln3": _make_ln_params(g, d_model),
        })
    return {
        "encoder": {
            "embed_w": g.normal((channels, d_model), dtype=MXU_DTYPE),
            "embed_b": g.zeros((d_model,)),
            "num_heads": num_heads,
            "layers": enc_layers,
        },
        "decoder": {
            "embed_w": g.normal((channels, d_model), dtype=MXU_DTYPE),
            "embed_b": g.zeros((d_model,)),
            "num_heads": num_heads,
            "layers": dec_layers,
        },
    }


# ----------------------------------------------------------------------------
# Main
# ----------------------------------------------------------------------------

if __name__ == "__main__":
    B, C = 2, 4            # batch, channels (per-timestep feature dim)
    T_IN, T_OUT = 16, 8    # encoder context length, decoder / prediction length
    D, H, F = 32, 4, 64    # d_model, heads, ffn hidden
    ENC_LAYERS, DEC_LAYERS = 1, 1

    key = jax.random.PRNGKey(0)
    k_params, k_x, k_pred = jax.random.split(key, 3)

    params = make_params(k_params, C, D, H, F, ENC_LAYERS, DEC_LAYERS)

    input_sequences = jax.random.normal(k_x, (B, T_IN, C), dtype=jnp.float32)
    pred_sequences = jax.random.normal(k_pred, (B, C, T_OUT), dtype=jnp.float32)

    hidden_states = tdnast_forward(params, input_sequences, pred_sequences)
    hidden_states = jax.block_until_ready(hidden_states)

    assert hidden_states.shape == (B, T_OUT, D), hidden_states.shape
    assert bool(jnp.all(jnp.isfinite(hidden_states)))
    print("KERNEL_OK")
</pallas_src>

<mosaic_0001>
module attributes {stable_mosaic.version = 11 : i64} {
  func.func @_linear_kernel(%arg0: i32, %arg1: memref<16x4xf32, #tpu.memory_space<vmem>>, %arg2: memref<4x32xbf16, #tpu.memory_space<vmem>>, %arg3: memref<1x32xf32, #tpu.memory_space<vmem>>, %arg4: memref<16x32xf32, #tpu.memory_space<vmem>>) attributes {dimension_semantics = [#tpu.dimension_semantics<parallel>], iteration_bounds = array<i64: 2>, scalar_prefetch = 0 : i64, scratch_operands = 0 : i64, tpu.core_type = #tpu.core_type<tc>, window_params = [{transform_indices = @transform_0, window_bounds = array<i64: 16, 4>}, {pipeline_mode = #tpu.pipeline_mode<synchronous>, transform_indices = @transform_1, window_bounds = array<i64: 4, 32>}, {pipeline_mode = #tpu.pipeline_mode<synchronous>, transform_indices = @transform_2, window_bounds = array<i64: 1, 32>}, {transform_indices = @transform_3, window_bounds = array<i64: 16, 32>}]} {
    %c0 = arith.constant 0 : index
    %c0_0 = arith.constant 0 : index
    %0 = vector.load %arg1[%c0, %c0_0] : memref<16x4xf32, #tpu.memory_space<vmem>>, vector<16x4xf32>
    %c0_1 = arith.constant 0 : index
    %c0_2 = arith.constant 0 : index
    %1 = vector.load %arg2[%c0_1, %c0_2] : memref<4x32xbf16, #tpu.memory_space<vmem>>, vector<4x32xbf16>
    %2 = arith.truncf %0 : vector<16x4xf32> to vector<16x4xbf16>
    %cst = arith.constant dense<0.000000e+00> : vector<16x32xf32>
    %3 = tpu.matmul %2, %1, %cst {dimension_numbers = #tpu.dot_dimension_numbers<[1], [0], [0], [1], [0, 0, 1, 1], [], []>} : vector<16x4xbf16>, vector<4x32xbf16>, vector<16x32xf32> -> vector<16x32xf32>
    %c0_3 = arith.constant 0 : index
    %c0_4 = arith.constant 0 : index
    %4 = vector.load %arg3[%c0_3, %c0_4] : memref<1x32xf32, #tpu.memory_space<vmem>>, vector<1x32xf32>
    %5 = vector.broadcast %4 : vector<1x32xf32> to vector<16x32xf32>
    %6 = arith.addf %3, %5 : vector<16x32xf32>
    %c0_5 = arith.constant 0 : index
    %c0_6 = arith.constant 0 : index
    %7 = vector.load %arg4[%c0_5, %c0_6] : memref<16x32xf32, #tpu.memory_space<vmem>>, vector<16x32xf32>
    tpu.vector_store %arg4[%c0_5, %c0_6], %6 {strides = array<i32>} : memref<16x32xf32, #tpu.memory_space<vmem>>, vector<16x32xf32>,
    return
  }
  func.func @transform_0(%arg0: i32) -> (i32, i32) {
    %c0_i32 = arith.constant 0 : i32
    %c0_i32_0 = arith.constant 0 : i32
    return %arg0, %c0_i32 : i32, i32
  }
  func.func @transform_1(%arg0: i32) -> (i32, i32) {
    %c0_i32 = arith.constant 0 : i32
    %c0_i32_0 = arith.constant 0 : i32
    %c0_i32_1 = arith.constant 0 : i32
    return %c0_i32, %c0_i32_0 : i32, i32
  }
  func.func @transform_2(%arg0: i32) -> (i32, i32) {
    %c0_i32 = arith.constant 0 : i32
    %c0_i32_0 = arith.constant 0 : i32
    %c0_i32_1 = arith.constant 0 : i32
    return %c0_i32, %c0_i32_0 : i32, i32
  }
  func.func @transform_3(%arg0: i32) -> (i32, i32) {
    %c0_i32 = arith.constant 0 : i32
    %c0_i32_0 = arith.constant 0 : i32
    return %arg0, %c0_i32 : i32, i32
  }
}

</mosaic_0001>

<bundles_post_ra>
// kernel: tpu_custom_call.1
= control target key start
LH: loop header
LB: loop body
LE: loop exit
PB: predicated region body
PF: predicated region fallthrough
CT: control target
= control target key end

     0   :  { %8 = vsyncpa [#allocation3], 0  ;;  %s516_s0 = inlined_call_operand.vmem [shape: f32[32,4], index: 0, kind: input, shape index: {}]   ;;  %s517_s1 = inlined_call_operand.vmem [shape: bf16[4,32], index: 1, kind: input, shape index: {}]   ;;  %s518_s2 = inlined_call_operand.vmem [shape: f32[1,32], index: 2, kind: input, shape index: {}]   ;;  %s519_s3 = inlined_call_operand.hbm [shape: f32[32,32], index: 3, kind: output, shape index: {}]  }
   0x1   :  { %10 = vsyncpa [#allocation3 + $0x1], 0  ;;  %s426_s12 = smov 0   ;;  %s428_s13 = smov 0  }
   0x2   :  { %s430_s14 = smov 0   ;;  %s432_s15 = smov 0  }
   0x3 LB: > { %s447_s16 = sadd.s32 4294967295, %s402_s15   ;;  %s284_s17 = sadd.s32 4294967294, %s402_s15   ;;  %s402_s15 = sphi %s432_s15, %s525_s15   ;;  %s398_s14 = sphi %s430_s14, %s524_s14   ;;  %s394_s13 = sphi %s428_s13, %s523_s13   ;;  %s390_s12 = sphi %s426_s12, %s522_s12  }
   0x4   : > { %s451_s18 = sadd.s32 1, %s402_s15   ;;  %s91_s19 = sadd.s32 1, %s398_s14 }
   0x5   : > { %s88_s20 = ssub.s32 %s402_s15, %s451_s18  ;;  %p101_p0 = scmp.ne.s32.totalorder %s398_s14, %s394_s13 }
   0x6   : > { %p89_p1 = scmp.eq.s32.totalorder %s88_s20, 0  ;;  %p102_p2 = scmp.eq.s32.totalorder %s447_s16, 1 }
   0x7   : > { %p107_p3 = scmp.ne.s32.totalorder %s394_s13, %s390_s12  ;;  %p108_p4 = scmp.eq.s32.totalorder %s284_s17, 1 }
   0x8   : > { %s462_s21 = scalar_select %p89_p1, %s398_s14, %s91_s19  }
   0x9   : > { %p464_p5 = por %p102_p2, %p101_p0  ;;  %p468_p6 = por %p108_p4, %p107_p3 }
   0xa   : > { %p287_p7 = scmp.ge.s32.totalorder %s402_s15, 1  ;;  %p141_p8 = scmp.lt.s32.totalorder %s402_s15, 3 }
   0xc   : > { %p142_p9 = pnand %p287_p7, %p141_p8 }
   0xd   : > { %s289_s26 = sshll.u32 (!%p142_p9), %s447_s16, 1  ;;  %s162_s4 = sand.u32 (!%p142_p9), 1, %s394_s13  }
   0xe   : > { %145 = sbr.rel (%p142_p9) target bundleno = 165 (0xa5), region = 32  ;;  %p166_p10 = scmp.lt.s32.totalorder (!%p142_p9), %s289_s26, 3 }
   0xf   : > { %s288_s5 = sshll.u32 (!%p142_p9), %s162_s4, 4  ;;  %s297_s8 = sshll.u32 (!%p142_p9), %s447_s16, 4 }
  0x10   : > { %s218_s11 = scalar_lea.hbm (!%p142_p9), %s519_s3, %s297_s8  ;;  %s164_s17 = scalar_lea.vmem (!%p142_p9), [#allocation2], %s288_s5 }
  0x11   : > { %s219_s19 = sshll.u32 (!%p142_p9), %s164_s17, 4  ;;  %s221_s20 = sshll.u32 (!%p142_p9), %s218_s11, 4  ;;  %s220_s19 = int_to_ptr.vmem [resolvable:$true] %s219_s19  ;;  %s222_s20 = int_to_ptr.hbm [resolvable:$true] %s221_s20 }
  0x12   : > { %s207_s24 = scalar_lea.sflag (!%p142_p9), [#allocation3], %s162_s4  ;;  %s354_s25 = sshra.s32 (!%p142_p9), %s222_s20, 4  ;;  %s355_s25 = int_to_ptr.hbm [resolvable:$true] %s354_s25 }
  0x13   : > { %v175_v0 = vld [vmem:[%s517_s1] sm:$0x3]  ;;  %vm185_vm0 = vcmask 1041408   ;;  %s527_s26 = smov (!%p166_p10, %s289_s26), 3  ;;  %vm181_vm1 = vcmask 31744   ;;  %vm203_vm2 = vcmask 261120   ;;  %p361_p0 = scmp.lt.s32.totalorder %s355_s25, %s519_s3 }
  0x14   : > { %v187_v1 = vsel %vm185_vm0, %v175_v0, 0  ;;  %s290_s27 = sshll.u32 %s527_s26, 3  ;;  %v339_v5 = vld [vmem:[%s518_s2] ss:$0 sm:$0xff]  ;;  %s356_s16 = scalar_lea.hbm %s355_s25, 16 }
  0x15   : > { %196 = vmatpush.bf16.msra.mxu0 %v187_v1  ;;  %s169_s30 = scalar_lea.vmem %s516_s0, %s290_s27  ;;  %p357_p11 = scmp.ne.s32.totalorder %s355_s25, %s356_s16 }
  0x16   : > { %v173_v2 = vld [vmem:[%s169_s30] sm:$0xff]  ;;  %v174_v3 = vld [vmem:[%s169_s30 + $0x8] sm:$0xff]  ;;  %s360_s28 = scalar_lea.hbm %s519_s3, 32 }
  0x17   : > { %v176_v4 = vpack.c.bf16 %v174_v3, %v173_v2  ;;  %p358_p12 = pnand %p357_p11, %p464_p5  ;;  %p362_p1 = scmp.lt.s32.totalorder %s360_s28, %s356_s16 }
  0x19   : > { %291 = vmatmul.msk.bf16.vlgmr.msra.gmra.mxu0 %vm181_vm1, %v176_v4  ;;  %p359_p13 = pneg %p358_p12  ;;  %p363_p2 = por %p362_p1, %p361_p0 }
  0x1b   : > { %p364_p3 = pnand %p363_p2, %p359_p13 }
  0x96   : > { %v198_v6 = vpop.f32.mrf.mxu0 }
  0x97   : > { %v199_v7 = vadd.f32 %v339_v5, %v198_v6 }
  0x99   : > { %204 = vst.msk [vmem:[%s164_s17] sm:$0xff] %vm203_vm2, %v199_v7 }
  0x9e   : > { %v200_v8 = vpop.f32.mrf.mxu0 }
  0x9f   : > { %v201_v9 = vadd.f32 %v339_v5, %v200_v8 }
  0xa1   : > { %205 = vst.msk [vmem:[%s164_s17 + $0x8] sm:$0xff] %vm203_vm2, %v201_v9 }
  0xa2   : > { %367 = shalt.err (!%p364_p3)
}
  0xa3   : > { %s404_s4 = smov 128   ;;  %s405_s5 = smov 8  }
  0xa4   : > { %298 = dma.vmem_to_hbm [thread:$0]  (%p464_p5), %s220_s19, 256, %s222_s20, %s207_s24, %s404_s4, %s404_s4, %s405_s5  }
  0xa5 PF: > { %p304_p4 = scmp.ge.s32.totalorder %s402_s15, 2  ;;  %s236_s6 = sand.u32 1, %s390_s12  }
  0xa6   : > { %s237_s7 = scalar_lea.sflag [#allocation3], %s236_s6 }
  0xa7   : > { %p301_p7 = pnand %p304_p4, %p468_p6 }
  0xa9   : > { %p302_p8 = pneg %p301_p7 }
  0xab   : > { %385 = dma.done.wait (%p302_p8), %s237_s7, 256  }
  0xac   : > { %387 = vsyncadd (%p302_p8), %s237_s7, 4294967040  ;;  %p13_p9 = scmp.ge.s32.totalorder %s451_s18, 4   ;;  %s522_s12 = smov %s394_s13 }
  0xad   : > { %s523_s13 = smov %s398_s14  ;;  %s524_s14 = smov %s462_s21 }
  0xae   : > { %s525_s15 = smov %s451_s18  ;;  %15 = sbr.rel (!%p13_p9) target bundleno = 3 (0x3), region = 67 }
  0xb3   :  { %243 = vsyncpa [#allocation3], 1 }
  0xb4   :  { %245 = vsyncpa [#allocation3 + $0x1], 1 }

</bundles_post_ra>
